<compile_context>
chip_gen: v7x
topology: tpu7x:2x2x1
jax: 0.10.0
libtpu: 0.0.40
codegen_flags: <defaults>
</compile_context>

<pallas_src>
import math

import numpy as np

import jax
import jax.numpy as jnp
from jax.experimental import pallas as pl
from jax.experimental.pallas import tpu as pltpu


HIDDEN = 100            # module default hidden_layers
HIDDEN_PAD = 128        # padded per-branch hidden width (lane-aligned)
WIDE = 2 * HIDDEN_PAD   # fused (both-branch) activation width
OUT = 1                 # module default output

# x[:, :4] @ _DELTA == cat([xw[:,:3]-xw[:,3:4], xw[:,:2]-xw[:,2:3], xw[:,:1]-xw[:,1:2]], 1)
_DELTA = np.array(
    [[ 1.,  0.,  0.,  1.,  0.,  1.],
     [ 0.,  1.,  0.,  0.,  1., -1.],
     [ 0.,  0.,  1., -1., -1.,  0.],
     [-1., -1., -1.,  0.,  0.,  0.]], dtype=np.float32)


# --------------------------------------------------------------------------
# Kernels
# --------------------------------------------------------------------------

def _gbfcn_kernel_split(
    x_ref,
    w_in_ref, b_in_ref, w1_ref, b1_ref, w2_ref, b2_ref,
    a_in_ref, ab_in_ref, a1_ref, ab1_ref, a2_ref, ab2_ref,
    w3w_ref, w3a_ref, b3_ref, woutT_ref, bout_ref,
    out_ref,
):
    """128-wide two-branch variant (used on v5e / unknown chips)."""
    f32 = jnp.float32
    x = x_ref[...]                                    # (bn, 14)

    # xw branch (delta features folded into w_in): tanh MLP + residuals.
    h = jnp.tanh(jnp.dot(x, w_in_ref[...], preferred_element_type=f32) + b_in_ref[...])
    h = jnp.tanh(jnp.dot(h, w1_ref[...], preferred_element_type=f32) + b1_ref[...]) + h
    h = jnp.tanh(jnp.dot(h, w2_ref[...], preferred_element_type=f32) + b2_ref[...]) + h

    # xadj branch (col-zeroing folded into a_in): relu MLP.
    # TODO(synk): training-mode dropout not implemented (inference identity).
    a = jnp.maximum(jnp.dot(x, a_in_ref[...], preferred_element_type=f32) + ab_in_ref[...], 0.0)
    a = jnp.maximum(jnp.dot(a, a1_ref[...], preferred_element_type=f32) + ab1_ref[...], 0.0)
    a = jnp.maximum(jnp.dot(a, a2_ref[...], preferred_element_type=f32) + ab2_ref[...], 0.0)

    # fusion: cat([h, a]) @ W3 == h @ W3[:H] + a @ W3[H:]
    z = jnp.tanh(
        jnp.dot(h, w3w_ref[...], preferred_element_type=f32)
        + jnp.dot(a, w3a_ref[...], preferred_element_type=f32)
        + b3_ref[...]
    )

    # fc_out: single output column -> VPU mul + lane reduce.
    y = jnp.sum(z * woutT_ref[...], axis=-1, keepdims=True) + bout_ref[...]
    out_ref[...] = jnp.clip(jnp.exp(y + 1.0) - 4.0 - math.e, -4.0, -1.0)


def _gbfcn_kernel_fused(
    x_ref,
    w_in_ref, b_in_ref, w1_ref, b1_ref, w2_ref, b2_ref,
    w3_ref, b3_ref, woutT_ref, bout_ref,
    out_ref,
):
    """256-wide block-diagonal variant (v6e/v7x, 2x256^2 MXU).

    Lanes [0,128) carry the xw (tanh+residual) branch, lanes [128,256) the
    xadj (relu) branch.  Slices are at the 128-lane boundary so they are
    tile-aligned; tanh is only evaluated on the 128 tanh lanes.
    """
    f32 = jnp.float32
    HP = HIDDEN_PAD
    x = x_ref[...]                                    # (bn, 14)

    # layer 0 (feature engineering folded into w_in / zeroed rows)
    u = jnp.dot(x, w_in_ref[...], preferred_element_type=f32) + b_in_ref[...]
    ht = jnp.tanh(u[:, :HP])
    hr = jnp.maximum(u[:, HP:], 0.0)
    h = jnp.concatenate([ht, hr], axis=-1)            # (bn, 256)

    # layer 1 (block-diag weights); residual only on the tanh half
    u = jnp.dot(h, w1_ref[...], preferred_element_type=f32) + b1_ref[...]
    ht = jnp.tanh(u[:, :HP]) + ht
    hr = jnp.maximum(u[:, HP:], 0.0)
    h = jnp.concatenate([ht, hr], axis=-1)

    # layer 2
    # TODO(synk): training-mode dropout not implemented (inference identity).
    u = jnp.dot(h, w2_ref[...], preferred_element_type=f32) + b2_ref[...]
    ht = jnp.tanh(u[:, :HP]) + ht
    hr = jnp.maximum(u[:, HP:], 0.0)
    h = jnp.concatenate([ht, hr], axis=-1)

    # fc3: single (bn,256) @ (256,128) matmul (both halves of W3 stacked)
    z = jnp.tanh(jnp.dot(h, w3_ref[...], preferred_element_type=f32) + b3_ref[...])

    # fc_out: single output column -> VPU mul + lane reduce.
    y = jnp.sum(z * woutT_ref[...], axis=-1, keepdims=True) + bout_ref[...]
    out_ref[...] = jnp.clip(jnp.exp(y + 1.0) - 4.0 - math.e, -4.0, -1.0)


# --------------------------------------------------------------------------
# Weight preparation
# --------------------------------------------------------------------------

def _round_up(n, m):
    return ((n + m - 1) // m) * m


def _pad2(a, rows, cols):
    r, c = a.shape
    return jnp.pad(a, ((0, rows - r), (0, cols - c)))


def _prepare_weights_split(params):
    """Fold feature engineering into layer-1 weights and zero-pad HIDDEN->128."""
    (w_in, b_in, w1, b1, w2, b2,
     a_in, ab_in, a1, ab1, a2, ab2,
     w3, b3, wout, bout) = params
    H, HP = HIDDEN, HIDDEN_PAD

    D = jnp.asarray(_DELTA)                                   # (4, 6)
    w_in_fold = D @ w_in                                      # (4, H)
    w_in_full = jnp.zeros((14, HP), jnp.float32).at[:4, :H].set(w_in_fold)

    a_in_z = a_in.at[4, :].set(0.0).at[9, :].set(0.0)         # zero xadj cols 4/9
    a_in_full = jnp.zeros((14, HP), jnp.float32).at[4:14, :H].set(a_in_z)

    return (
        w_in_full, _pad2(b_in, 1, HP),
        _pad2(w1, HP, HP), _pad2(b1, 1, HP),
        _pad2(w2, HP, HP), _pad2(b2, 1, HP),
        a_in_full, _pad2(ab_in, 1, HP),
        _pad2(a1, HP, HP), _pad2(ab1, 1, HP),
        _pad2(a2, HP, HP), _pad2(ab2, 1, HP),
        _pad2(w3[:H, :], HP, HP),          # fc3 weight, xw half
        _pad2(w3[H:, :], HP, HP),          # fc3 weight, xadj half
        _pad2(b3, 1, HP),
        _pad2(wout.T, 1, HP),              # fc_out weight as a lane row
        bout,                              # (1, 1)
    )


def _prepare_weights_fused(params):
    """Same folding, but both branches packed into 256-lane block-diag weights."""
    (w_in, b_in, w1, b1, w2, b2,
     a_in, ab_in, a1, ab1, a2, ab2,
     w3, b3, wout, bout) = params
    H, HP, WP = HIDDEN, HIDDEN_PAD, WIDE

    D = jnp.asarray(_DELTA)                                   # (4, 6)
    w_in_fold = D @ w_in                                      # (4, H)
    a_in_z = a_in.at[4, :].set(0.0).at[9, :].set(0.0)         # (10, H)

    w_in_full = (jnp.zeros((14, WP), jnp.float32)
                 .at[:4, :H].set(w_in_fold)
                 .at[4:14, HP:HP + H].set(a_in_z))
    b_in_full = (jnp.zeros((1, WP), jnp.float32)
                 .at[:, :H].set(b_in)
                 .at[:, HP:HP + H].set(ab_in))

    def block_diag(wa, wb, ba, bb):
        w = (jnp.zeros((WP, WP), jnp.float32)
             .at[:H, :H].set(wa)
             .at[HP:HP + H, HP:HP + H].set(wb))
        b = (jnp.zeros((1, WP), jnp.float32)
             .at[:, :H].set(ba)
             .at[:, HP:HP + H].set(bb))
        return w, b

    w1_full, b1_full = block_diag(w1, a1, b1, ab1)
    w2_full, b2_full = block_diag(w2, a2, b2, ab2)

    w3_full = (jnp.zeros((WP, HP), jnp.float32)
               .at[:H, :H].set(w3[:H, :])
               .at[HP:HP + H, :H].set(w3[H:, :]))
    return (
        w_in_full, b_in_full,
        w1_full, b1_full,
        w2_full, b2_full,
        w3_full, _pad2(b3, 1, HP),
        _pad2(wout.T, 1, HP),
        bout,                              # (1, 1)
    )


def _has_wide_mxu():
    """True on chips with 256-wide MXUs (v6e / v7x); False on v5e and older."""
    kind = ""
    try:
        kind = jax.devices()[0].device_kind
    except Exception:
        pass
    try:
        info = pltpu.get_tpu_info()
        kind += " " + str(getattr(info, "chip_version", ""))
    except Exception:
        pass
    kind = kind.lower()
    return ("v6" in kind) or ("v7" in kind)


# --------------------------------------------------------------------------
# Wrapper
# --------------------------------------------------------------------------

def gbfcn2_iswap_forward(x, params, *, block_n=1024, fuse_branches=None):
    """x: (N, 14) float32.  Returns (N, 1) float32."""
    assert x.ndim == 2 and x.shape[1] == 14
    N = x.shape[0]

    if fuse_branches is None:
        fuse_branches = _has_wide_mxu()

    if fuse_branches:
        kernel = _gbfcn_kernel_fused
        weight_args = _prepare_weights_fused(params)
    else:
        kernel = _gbfcn_kernel_split
        weight_args = _prepare_weights_split(params)

    # Effective block: large for throughput, but never larger than the
    # (8-rounded) batch.
    bn = _round_up(min(block_n, _round_up(max(N, 1), 8)), 8)
    # Prefer >= 2 grid steps when the batch allows it, so the "parallel" grid
    # axis can shard across v7x's two TensorCores (harmless elsewhere).
    if N > 8 and _round_up(N, bn) // bn < 2:
        bn = _round_up(-(-N // 2), 8)
    n_pad = _round_up(N, bn)
    x_p = jnp.pad(x, ((0, n_pad - N), (0, 0))) if n_pad != N else x
    grid = (n_pad // bn,)

    weight_bytes = sum(int(np.prod(w.shape)) * 4 for w in weight_args)
    # VMEM budget: double-buffered, lane-padded x/out tiles + generous room for
    # live (bn, 256) activation temporaries + resident weights.  Floor raises
    # v5e's 16 MiB default scoped limit; cap stays below v7x's 64 MiB physical.
    vmem_limit = int(min(
        56 << 20,
        max(16 << 20,
            4 * bn * 128 * 4           # x / out tiles, double-buffered, lane-padded
            + 12 * bn * WIDE * 4       # live activations (generous)
            + 2 * weight_bytes         # resident weights
            + (4 << 20)),              # slack
    ))

    flops_per_row = 2 * (14 * WIDE + 2 * WIDE * WIDE + WIDE * HIDDEN_PAD + HIDDEN_PAD)
    cost = pl.CostEstimate(
        flops=int(n_pad) * flops_per_row,
        transcendentals=int(n_pad) * (4 * HIDDEN_PAD + 1),
        bytes_accessed=int(n_pad) * (14 + 1) * 4 + weight_bytes,
    )

    def full_spec(arr):
        return pl.BlockSpec(arr.shape, lambda i: (0, 0))

    in_specs = ([pl.BlockSpec((bn, 14), lambda i: (i, 0))]
                + [full_spec(w) for w in weight_args])
    out_spec = pl.BlockSpec((bn, OUT), lambda i: (i, 0))

    out = pl.pallas_call(
        kernel,
        out_shape=jax.ShapeDtypeStruct((n_pad, OUT), jnp.float32),
        grid_spec=pltpu.PrefetchScalarGridSpec(
            num_scalar_prefetch=0,
            grid=grid,
            in_specs=in_specs,
            out_specs=out_spec,
        ),
        compiler_params=pltpu.CompilerParams(
            dimension_semantics=("parallel",),
            vmem_limit_bytes=vmem_limit,
        ),
        cost_estimate=cost,
    )(x_p, *weight_args)

    return out[:N]


# --------------------------------------------------------------------------
# Params + reference
# --------------------------------------------------------------------------

def init_params(key, hidden=HIDDEN, output=OUT):
    """PyTorch-Linear-style init U(-1/sqrt(fan_in), 1/sqrt(fan_in)).
    Weights are stored transposed as (in_features, out_features)."""
    def linear(k, fan_in, fan_out):
        kw, kb = jax.random.split(k)
        bound = 1.0 / math.sqrt(fan_in)
        w = jax.random.uniform(kw, (fan_in, fan_out), jnp.float32, -bound, bound)
        b = jax.random.uniform(kb, (1, fan_out), jnp.float32, -bound, bound)
        return w, b

    keys = jax.random.split(key, 8)
    w_in, b_in = linear(keys[0], 6, hidden)
    w1, b1 = linear(keys[1], hidden, hidden)
    w2, b2 = linear(keys[2], hidden, hidden)
    a_in, ab_in = linear(keys[3], 10, hidden)
    a1, ab1 = linear(keys[4], hidden, hidden)
    a2, ab2 = linear(keys[5], hidden, hidden)
    w3, b3 = linear(keys[6], hidden * 2, hidden)
    wout, bout = linear(keys[7], hidden, output)
    return (w_in, b_in, w1, b1, w2, b2,
            a_in, ab_in, a1, ab1, a2, ab2,
            w3, b3, wout, bout)


def _reference_forward(x, params):
    """Plain-JAX reference matching the PyTorch module (eval mode)."""
    (w_in, b_in, w1, b1, w2, b2,
     a_in, ab_in, a1, ab1, a2, ab2,
     w3, b3, wout, bout) = params
    xw = x[:, :4]
    xadj = x[:, 4:]
    xw6 = jnp.concatenate(
        [xw[:, :3] - xw[:, 3:4], xw[:, :2] - xw[:, 2:3], xw[:, :1] - xw[:, 1:2]],
        axis=1)
    xa = xadj.at[:, 4].set(0.0).at[:, 9].set(0.0)
    h = jnp.tanh(xw6 @ w_in + b_in)
    h = jnp.tanh(h @ w1 + b1) + h
    h = jnp.tanh(h @ w2 + b2) + h
    a = jax.nn.relu(xa @ a_in + ab_in)
    a = jax.nn.relu(a @ a1 + ab1)
    a = jax.nn.relu(a @ a2 + ab2)
    cat = jnp.concatenate([h, a], axis=1)
    z = jnp.tanh(cat @ w3 + b3)
    y = z @ wout + bout
    return jnp.clip(jnp.exp(y + 1.0) - 4.0 - math.e, -4.0, -1.0)


if __name__ == "__main__":
    key = jax.random.PRNGKey(0)
    kx, kp = jax.random.split(key)
    params = init_params(kp)

    # Small shape consistent with the module: batch=16, 14 features.
    N = 16
    x = jax.random.normal(kx, (N, 14), dtype=jnp.float32)
    ref = _reference_forward(x, params)
    out = jax.block_until_ready(gbfcn2_iswap_forward(x, params))
    assert out.shape == (N, OUT)
    assert jnp.allclose(out, ref, atol=1e-4, rtol=1e-4)

    # Exercise batch padding, a multi-step grid, and BOTH kernel variants
    # (split 128-wide and fused 256-wide block-diagonal) regardless of chip.
    N2 = 300
    x2 = jax.random.normal(jax.random.PRNGKey(1), (N2, 14), dtype=jnp.float32)
    ref2 = _reference_forward(x2, params)
    for fuse in (False, True):
        out2 = jax.block_until_ready(
            gbfcn2_iswap_forward(x2, params, block_n=128, fuse_branches=fuse))
        assert out2.shape == (N2, OUT)
        assert jnp.allclose(out2, ref2, atol=1e-4, rtol=1e-4)

    print("KERNEL_OK")
</pallas_src>

<mosaic_0001>
module attributes {stable_mosaic.version = 11 : i64} {
  func.func @_gbfcn_kernel_split(%arg0: i32, %arg1: memref<8x14xf32, #tpu.memory_space<vmem>>, %arg2: memref<14x128xf32, #tpu.memory_space<vmem>>, %arg3: memref<1x128xf32, #tpu.memory_space<vmem>>, %arg4: memref<128x128xf32, #tpu.memory_space<vmem>>, %arg5: memref<1x128xf32, #tpu.memory_space<vmem>>, %arg6: memref<128x128xf32, #tpu.memory_space<vmem>>, %arg7: memref<1x128xf32, #tpu.memory_space<vmem>>, %arg8: memref<14x128xf32, #tpu.memory_space<vmem>>, %arg9: memref<1x128xf32, #tpu.memory_space<vmem>>, %arg10: memref<128x128xf32, #tpu.memory_space<vmem>>, %arg11: memref<1x128xf32, #tpu.memory_space<vmem>>, %arg12: memref<128x128xf32, #tpu.memory_space<vmem>>, %arg13: memref<1x128xf32, #tpu.memory_space<vmem>>, %arg14: memref<128x128xf32, #tpu.memory_space<vmem>>, %arg15: memref<128x128xf32, #tpu.memory_space<vmem>>, %arg16: memref<1x128xf32, #tpu.memory_space<vmem>>, %arg17: memref<1x128xf32, #tpu.memory_space<vmem>>, %arg18: memref<1x1xf32, #tpu.memory_space<vmem>>, %arg19: memref<8x1xf32, #tpu.memory_space<vmem>>) attributes {dimension_semantics = [#tpu.dimension_semantics<parallel>], iteration_bounds = array<i64: 2>, scalar_prefetch = 0 : i64, scratch_operands = 0 : i64, tpu.core_type = #tpu.core_type<tc>, window_params = [{transform_indices = @transform_0, window_bounds = array<i64: 8, 14>}, {pipeline_mode = #tpu.pipeline_mode<synchronous>, transform_indices = @transform_1, window_bounds = array<i64: 14, 128>}, {pipeline_mode = #tpu.pipeline_mode<synchronous>, transform_indices = @transform_2, window_bounds = array<i64: 1, 128>}, {pipeline_mode = #tpu.pipeline_mode<synchronous>, transform_indices = @transform_3, window_bounds = array<i64: 128, 128>}, {pipeline_mode = #tpu.pipeline_mode<synchronous>, transform_indices = @transform_4, window_bounds = array<i64: 1, 128>}, {pipeline_mode = #tpu.pipeline_mode<synchronous>, transform_indices = @transform_5, window_bounds = array<i64: 128, 128>}, {pipeline_mode = #tpu.pipeline_mode<synchronous>, transform_indices = @transform_6, window_bounds = array<i64: 1, 128>}, {pipeline_mode = #tpu.pipeline_mode<synchronous>, transform_indices = @transform_7, window_bounds = array<i64: 14, 128>}, {pipeline_mode = #tpu.pipeline_mode<synchronous>, transform_indices = @transform_8, window_bounds = array<i64: 1, 128>}, {pipeline_mode = #tpu.pipeline_mode<synchronous>, transform_indices = @transform_9, window_bounds = array<i64: 128, 128>}, {pipeline_mode = #tpu.pipeline_mode<synchronous>, transform_indices = @transform_10, window_bounds = array<i64: 1, 128>}, {pipeline_mode = #tpu.pipeline_mode<synchronous>, transform_indices = @transform_11, window_bounds = array<i64: 128, 128>}, {pipeline_mode = #tpu.pipeline_mode<synchronous>, transform_indices = @transform_12, window_bounds = array<i64: 1, 128>}, {pipeline_mode = #tpu.pipeline_mode<synchronous>, transform_indices = @transform_13, window_bounds = array<i64: 128, 128>}, {pipeline_mode = #tpu.pipeline_mode<synchronous>, transform_indices = @transform_14, window_bounds = array<i64: 128, 128>}, {pipeline_mode = #tpu.pipeline_mode<synchronous>, transform_indices = @transform_15, window_bounds = array<i64: 1, 128>}, {pipeline_mode = #tpu.pipeline_mode<synchronous>, transform_indices = @transform_16, window_bounds = array<i64: 1, 128>}, {pipeline_mode = #tpu.pipeline_mode<synchronous>, transform_indices = @transform_17, window_bounds = array<i64: 1, 1>}, {transform_indices = @transform_18, window_bounds = array<i64: 8, 1>}]} {
    %c0 = arith.constant 0 : index
    %c0_0 = arith.constant 0 : index
    %0 = vector.load %arg1[%c0, %c0_0] : memref<8x14xf32, #tpu.memory_space<vmem>>, vector<8x14xf32>
    %c0_1 = arith.constant 0 : index
    %c0_2 = arith.constant 0 : index
    %1 = vector.load %arg2[%c0_1, %c0_2] : memref<14x128xf32, #tpu.memory_space<vmem>>, vector<14x128xf32>
    %cst = arith.constant dense<0.000000e+00> : vector<8x128xf32>
    %2 = tpu.matmul %0, %1, %cst {dimension_numbers = #tpu.dot_dimension_numbers<[1], [0], [0], [1], [0, 0, 1, 1], [], []>} : vector<8x14xf32>, vector<14x128xf32>, vector<8x128xf32> -> vector<8x128xf32>
    %c0_3 = arith.constant 0 : index
    %c0_4 = arith.constant 0 : index
    %3 = vector.load %arg3[%c0_3, %c0_4] : memref<1x128xf32, #tpu.memory_space<vmem>>, vector<1x128xf32>
    %4 = vector.broadcast %3 : vector<1x128xf32> to vector<8x128xf32>
    %5 = arith.addf %2, %4 : vector<8x128xf32>
    %6 = math.tanh %5 : vector<8x128xf32>
    %c0_5 = arith.constant 0 : index
    %c0_6 = arith.constant 0 : index
    %7 = vector.load %arg4[%c0_5, %c0_6] : memref<128x128xf32, #tpu.memory_space<vmem>>, vector<128x128xf32>
    %cst_7 = arith.constant dense<0.000000e+00> : vector<8x128xf32>
    %8 = tpu.matmul %6, %7, %cst_7 {dimension_numbers = #tpu.dot_dimension_numbers<[1], [0], [0], [1], [0, 0, 1, 1], [], []>} : vector<8x128xf32>, vector<128x128xf32>, vector<8x128xf32> -> vector<8x128xf32>
    %c0_8 = arith.constant 0 : index
    %c0_9 = arith.constant 0 : index
    %9 = vector.load %arg5[%c0_8, %c0_9] : memref<1x128xf32, #tpu.memory_space<vmem>>, vector<1x128xf32>
    %10 = vector.broadcast %9 : vector<1x128xf32> to vector<8x128xf32>
    %11 = arith.addf %8, %10 : vector<8x128xf32>
    %12 = math.tanh %11 : vector<8x128xf32>
    %13 = arith.addf %12, %6 : vector<8x128xf32>
    %c0_10 = arith.constant 0 : index
    %c0_11 = arith.constant 0 : index
    %14 = vector.load %arg6[%c0_10, %c0_11] : memref<128x128xf32, #tpu.memory_space<vmem>>, vector<128x128xf32>
    %cst_12 = arith.constant dense<0.000000e+00> : vector<8x128xf32>
    %15 = tpu.matmul %13, %14, %cst_12 {dimension_numbers = #tpu.dot_dimension_numbers<[1], [0], [0], [1], [0, 0, 1, 1], [], []>} : vector<8x128xf32>, vector<128x128xf32>, vector<8x128xf32> -> vector<8x128xf32>
    %c0_13 = arith.constant 0 : index
    %c0_14 = arith.constant 0 : index
    %16 = vector.load %arg7[%c0_13, %c0_14] : memref<1x128xf32, #tpu.memory_space<vmem>>, vector<1x128xf32>
    %17 = vector.broadcast %16 : vector<1x128xf32> to vector<8x128xf32>
    %18 = arith.addf %15, %17 : vector<8x128xf32>
    %19 = math.tanh %18 : vector<8x128xf32>
    %20 = arith.addf %19, %13 : vector<8x128xf32>
    %c0_15 = arith.constant 0 : index
    %c0_16 = arith.constant 0 : index
    %21 = vector.load %arg8[%c0_15, %c0_16] : memref<14x128xf32, #tpu.memory_space<vmem>>, vector<14x128xf32>
    %cst_17 = arith.constant dense<0.000000e+00> : vector<8x128xf32>
    %22 = tpu.matmul %0, %21, %cst_17 {dimension_numbers = #tpu.dot_dimension_numbers<[1], [0], [0], [1], [0, 0, 1, 1], [], []>} : vector<8x14xf32>, vector<14x128xf32>, vector<8x128xf32> -> vector<8x128xf32>
    %c0_18 = arith.constant 0 : index
    %c0_19 = arith.constant 0 : index
    %23 = vector.load %arg9[%c0_18, %c0_19] : memref<1x128xf32, #tpu.memory_space<vmem>>, vector<1x128xf32>
    %24 = vector.broadcast %23 : vector<1x128xf32> to vector<8x128xf32>
    %25 = arith.addf %22, %24 : vector<8x128xf32>
    %cst_20 = arith.constant 0.000000e+00 : f32
    %26 = vector.broadcast %cst_20 : f32 to vector<8x128xf32>
    %27 = arith.maximumf %25, %26 : vector<8x128xf32>
    %c0_21 = arith.constant 0 : index
    %c0_22 = arith.constant 0 : index
    %28 = vector.load %arg10[%c0_21, %c0_22] : memref<128x128xf32, #tpu.memory_space<vmem>>, vector<128x128xf32>
    %cst_23 = arith.constant dense<0.000000e+00> : vector<8x128xf32>
    %29 = tpu.matmul %27, %28, %cst_23 {dimension_numbers = #tpu.dot_dimension_numbers<[1], [0], [0], [1], [0, 0, 1, 1], [], []>} : vector<8x128xf32>, vector<128x128xf32>, vector<8x128xf32> -> vector<8x128xf32>
    %c0_24 = arith.constant 0 : index
    %c0_25 = arith.constant 0 : index
    %30 = vector.load %arg11[%c0_24, %c0_25] : memref<1x128xf32, #tpu.memory_space<vmem>>, vector<1x128xf32>
    %31 = vector.broadcast %30 : vector<1x128xf32> to vector<8x128xf32>
    %32 = arith.addf %29, %31 : vector<8x128xf32>
    %cst_26 = arith.constant 0.000000e+00 : f32
    %33 = vector.broadcast %cst_26 : f32 to vector<8x128xf32>
    %34 = arith.maximumf %32, %33 : vector<8x128xf32>
    %c0_27 = arith.constant 0 : index
    %c0_28 = arith.constant 0 : index
    %35 = vector.load %arg12[%c0_27, %c0_28] : memref<128x128xf32, #tpu.memory_space<vmem>>, vector<128x128xf32>
    %cst_29 = arith.constant dense<0.000000e+00> : vector<8x128xf32>
    %36 = tpu.matmul %34, %35, %cst_29 {dimension_numbers = #tpu.dot_dimension_numbers<[1], [0], [0], [1], [0, 0, 1, 1], [], []>} : vector<8x128xf32>, vector<128x128xf32>, vector<8x128xf32> -> vector<8x128xf32>
    %c0_30 = arith.constant 0 : index
    %c0_31 = arith.constant 0 : index
    %37 = vector.load %arg13[%c0_30, %c0_31] : memref<1x128xf32, #tpu.memory_space<vmem>>, vector<1x128xf32>
    %38 = vector.broadcast %37 : vector<1x128xf32> to vector<8x128xf32>
    %39 = arith.addf %36, %38 : vector<8x128xf32>
    %cst_32 = arith.constant 0.000000e+00 : f32
    %40 = vector.broadcast %cst_32 : f32 to vector<8x128xf32>
    %41 = arith.maximumf %39, %40 : vector<8x128xf32>
    %c0_33 = arith.constant 0 : index
    %c0_34 = arith.constant 0 : index
    %42 = vector.load %arg14[%c0_33, %c0_34] : memref<128x128xf32, #tpu.memory_space<vmem>>, vector<128x128xf32>
    %cst_35 = arith.constant dense<0.000000e+00> : vector<8x128xf32>
    %43 = tpu.matmul %20, %42, %cst_35 {dimension_numbers = #tpu.dot_dimension_numbers<[1], [0], [0], [1], [0, 0, 1, 1], [], []>} : vector<8x128xf32>, vector<128x128xf32>, vector<8x128xf32> -> vector<8x128xf32>
    %c0_36 = arith.constant 0 : index
    %c0_37 = arith.constant 0 : index
    %44 = vector.load %arg15[%c0_36, %c0_37] : memref<128x128xf32, #tpu.memory_space<vmem>>, vector<128x128xf32>
    %cst_38 = arith.constant dense<0.000000e+00> : vector<8x128xf32>
    %45 = tpu.matmul %41, %44, %cst_38 {dimension_numbers = #tpu.dot_dimension_numbers<[1], [0], [0], [1], [0, 0, 1, 1], [], []>} : vector<8x128xf32>, vector<128x128xf32>, vector<8x128xf32> -> vector<8x128xf32>
    %46 = arith.addf %43, %45 : vector<8x128xf32>
    %c0_39 = arith.constant 0 : index
    %c0_40 = arith.constant 0 : index
    %47 = vector.load %arg16[%c0_39, %c0_40] : memref<1x128xf32, #tpu.memory_space<vmem>>, vector<1x128xf32>
    %48 = vector.broadcast %47 : vector<1x128xf32> to vector<8x128xf32>
    %49 = arith.addf %46, %48 : vector<8x128xf32>
    %50 = math.tanh %49 : vector<8x128xf32>
    %c0_41 = arith.constant 0 : index
    %c0_42 = arith.constant 0 : index
    %51 = vector.load %arg17[%c0_41, %c0_42] : memref<1x128xf32, #tpu.memory_space<vmem>>, vector<1x128xf32>
    %52 = vector.broadcast %51 : vector<1x128xf32> to vector<8x128xf32>
    %53 = arith.mulf %50, %52 : vector<8x128xf32>
    %cst_43 = arith.constant dense<0.000000e+00> : vector<8xf32>
    %54 = vector.multi_reduction <add>, %53, %cst_43 [1] : vector<8x128xf32> to vector<8xf32>
    %55 = vector.shape_cast %54 : vector<8xf32> to vector<8x1xf32>
    %c0_44 = arith.constant 0 : index
    %c0_45 = arith.constant 0 : index
    %56 = vector.load %arg18[%c0_44, %c0_45] : memref<1x1xf32, #tpu.memory_space<vmem>>, vector<1x1xf32>
    %57 = vector.broadcast %56 : vector<1x1xf32> to vector<8x1xf32>
    %58 = arith.addf %55, %57 : vector<8x1xf32>
    %cst_46 = arith.constant 1.000000e+00 : f32
    %59 = vector.broadcast %cst_46 : f32 to vector<8x1xf32>
    %60 = arith.addf %58, %59 : vector<8x1xf32>
    %61 = math.exp %60 : vector<8x1xf32>
    %cst_47 = arith.constant 4.000000e+00 : f32
    %62 = vector.broadcast %cst_47 : f32 to vector<8x1xf32>
    %63 = arith.subf %61, %62 : vector<8x1xf32>
    %cst_48 = arith.constant 2.71828175 : f32
    %64 = vector.broadcast %cst_48 : f32 to vector<8x1xf32>
    %65 = arith.subf %63, %64 : vector<8x1xf32>
    %cst_49 = arith.constant -4.000000e+00 : f32
    %cst_50 = arith.constant -1.000000e+00 : f32
    %66 = vector.broadcast %cst_49 : f32 to vector<8x1xf32>
    %67 = arith.maximumf %66, %65 : vector<8x1xf32>
    %68 = vector.broadcast %cst_50 : f32 to vector<8x1xf32>
    %69 = arith.minimumf %68, %67 : vector<8x1xf32>
    %c0_51 = arith.constant 0 : index
    %c0_52 = arith.constant 0 : index
    %70 = vector.load %arg19[%c0_51, %c0_52] : memref<8x1xf32, #tpu.memory_space<vmem>>, vector<8x1xf32>
    tpu.vector_store %arg19[%c0_51, %c0_52], %69 {strides = array<i32>} : memref<8x1xf32, #tpu.memory_space<vmem>>, vector<8x1xf32>,
    return
  }
  func.func @transform_0(%arg0: i32) -> (i32, i32) {
    %c0_i32 = arith.constant 0 : i32
    %c0_i32_0 = arith.constant 0 : i32
    return %arg0, %c0_i32 : i32, i32
  }
  func.func @transform_1(%arg0: i32) -> (i32, i32) {
    %c0_i32 = arith.constant 0 : i32
    %c0_i32_0 = arith.constant 0 : i32
    %c0_i32_1 = arith.constant 0 : i32
    return %c0_i32, %c0_i32_0 : i32, i32
  }
  func.func @transform_2(%arg0: i32) -> (i32, i32) {
    %c0_i32 = arith.constant 0 : i32
    %c0_i32_0 = arith.constant 0 : i32
    %c0_i32_1 = arith.constant 0 : i32
    return %c0_i32, %c0_i32_0 : i32, i32
  }
  func.func @transform_3(%arg0: i32) -> (i32, i32) {
    %c0_i32 = arith.constant 0 : i32
    %c0_i32_0 = arith.constant 0 : i32
    %c0_i32_1 = arith.constant 0 : i32
    return %c0_i32, %c0_i32_0 : i32, i32
  }
  func.func @transform_4(%arg0: i32) -> (i32, i32) {
    %c0_i32 = arith.constant 0 : i32
    %c0_i32_0 = arith.constant 0 : i32
    %c0_i32_1 = arith.constant 0 : i32
    return %c0_i32, %c0_i32_0 : i32, i32
  }
  func.func @transform_5(%arg0: i32) -> (i32, i32) {
    %c0_i32 = arith.constant 0 : i32
    %c0_i32_0 = arith.constant 0 : i32
    %c0_i32_1 = arith.constant 0 : i32
    return %c0_i32, %c0_i32_0 : i32, i32
  }
  func.func @transform_6(%arg0: i32) -> (i32, i32) {
    %c0_i32 = arith.constant 0 : i32
    %c0_i32_0 = arith.constant 0 : i32
    %c0_i32_1 = arith.constant 0 : i32
    return %c0_i32, %c0_i32_0 : i32, i32
  }
  func.func @transform_7(%arg0: i32) -> (i32, i32) {
    %c0_i32 = arith.constant 0 : i32
    %c0_i32_0 = arith.constant 0 : i32
    %c0_i32_1 = arith.constant 0 : i32
    return %c0_i32, %c0_i32_0 : i32, i32
  }
  func.func @transform_8(%arg0: i32) -> (i32, i32) {
    %c0_i32 = arith.constant 0 : i32
    %c0_i32_0 = arith.constant 0 : i32
    %c0_i32_1 = arith.constant 0 : i32
    return %c0_i32, %c0_i32_0 : i32, i32
  }
  func.func @transform_9(%arg0: i32) -> (i32, i32) {
    %c0_i32 = arith.constant 0 : i32
    %c0_i32_0 = arith.constant 0 : i32
    %c0_i32_1 = arith.constant 0 : i32
    return %c0_i32, %c0_i32_0 : i32, i32
  }
  func.func @transform_10(%arg0: i32) -> (i32, i32) {
    %c0_i32 = arith.constant 0 : i32
    %c0_i32_0 = arith.constant 0 : i32
    %c0_i32_1 = arith.constant 0 : i32
    return %c0_i32, %c0_i32_0 : i32, i32
  }
  func.func @transform_11(%arg0: i32) -> (i32, i32) {
    %c0_i32 = arith.constant 0 : i32
    %c0_i32_0 = arith.constant 0 : i32
    %c0_i32_1 = arith.constant 0 : i32
    return %c0_i32, %c0_i32_0 : i32, i32
  }
  func.func @transform_12(%arg0: i32) -> (i32, i32) {
    %c0_i32 = arith.constant 0 : i32
    %c0_i32_0 = arith.constant 0 : i32
    %c0_i32_1 = arith.constant 0 : i32
    return %c0_i32, %c0_i32_0 : i32, i32
  }
  func.func @transform_13(%arg0: i32) -> (i32, i32) {
    %c0_i32 = arith.constant 0 : i32
    %c0_i32_0 = arith.constant 0 : i32
    %c0_i32_1 = arith.constant 0 : i32
    return %c0_i32, %c0_i32_0 : i32, i32
  }
  func.func @transform_14(%arg0: i32) -> (i32, i32) {
    %c0_i32 = arith.constant 0 : i32
    %c0_i32_0 = arith.constant 0 : i32
    %c0_i32_1 = arith.constant 0 : i32
    return %c0_i32, %c0_i32_0 : i32, i32
  }
  func.func @transform_15(%arg0: i32) -> (i32, i32) {
    %c0_i32 = arith.constant 0 : i32
    %c0_i32_0 = arith.constant 0 : i32
    %c0_i32_1 = arith.constant 0 : i32
    return %c0_i32, %c0_i32_0 : i32, i32
  }
  func.func @transform_16(%arg0: i32) -> (i32, i32) {
    %c0_i32 = arith.constant 0 : i32
    %c0_i32_0 = arith.constant 0 : i32
    %c0_i32_1 = arith.constant 0 : i32
    return %c0_i32, %c0_i32_0 : i32, i32
  }
  func.func @transform_17(%arg0: i32) -> (i32, i32) {
    %c0_i32 = arith.constant 0 : i32
    %c0_i32_0 = arith.constant 0 : i32
    %c0_i32_1 = arith.constant 0 : i32
    return %c0_i32, %c0_i32_0 : i32, i32
  }
  func.func @transform_18(%arg0: i32) -> (i32, i32) {
    %c0_i32 = arith.constant 0 : i32
    %c0_i32_0 = arith.constant 0 : i32
    return %arg0, %c0_i32 : i32, i32
  }
}

</mosaic_0001>

<bundles_post_ra>
// kernel: tpu_custom_call.1
= control target key start
LH: loop header
LB: loop body
LE: loop exit
PB: predicated region body
PF: predicated region fallthrough
CT: control target
= control target key end

     0   :  { %s3053_s0 = inlined_call_operand.hbm [shape: f32[16,14], index: 0, kind: input, shape index: {}]   ;;  %s3054_s1 = inlined_call_operand.hbm [shape: f32[14,128], index: 1, kind: input, shape index: {}]   ;;  %s3055_s2 = inlined_call_operand.vmem [shape: f32[1,128], index: 2, kind: input, shape index: {}]   ;;  %s3056_s3 = inlined_call_operand.hbm [shape: f32[128,128], index: 3, kind: input, shape index: {}]   ;;  %s3057_s4 = inlined_call_operand.vmem [shape: f32[1,128], index: 4, kind: input, shape index: {}]   ;;  %s3058_s5 = inlined_call_operand.hbm [shape: f32[128,128], index: 5, kind: input, shape index: {}]   ;;  %s3059_s6 = inlined_call_operand.vmem [shape: f32[1,128], index: 6, kind: input, shape index: {}]   ;;  %s3060_s7 = inlined_call_operand.vmem [shape: f32[14,128], index: 7, kind: input, shape index: {}]   ;;  %s3061_s8 = inlined_call_operand.vmem [shape: f32[1,128], index: 8, kind: input, shape index: {}]   ;;  %s3062_s9 = inlined_call_operand.hbm [shape: f32[128,128], index: 9, kind: input, shape index: {}]   ;;  %s3063_s10 = inlined_call_operand.vmem [shape: f32[1,128], index: 10, kind: input, shape index: {}]   ;;  %s3064_s11 = inlined_call_operand.hbm [shape: f32[128,128], index: 11, kind: input, shape index: {}]   ;;  %s3065_s12 = inlined_call_operand.vmem [shape: f32[1,128], index: 12, kind: input, shape index: {}]   ;;  %s3066_s13 = inlined_call_operand.hbm [shape: f32[128,128], index: 13, kind: input, shape index: {}]   ;;  %s3067_s14 = inlined_call_operand.hbm [shape: f32[128,128], index: 14, kind: input, shape index: {}]   ;;  %s3068_s15 = inlined_call_operand.vmem [shape: f32[1,128], index: 15, kind: input, shape index: {}]   ;;  %s3069_s16 = inlined_call_operand.vmem [shape: f32[1,128], index: 16, kind: input, shape index: {}]   ;;  %s3070_s17 = inlined_call_operand.<no memory space> [shape: f32[1,1], index: 17, kind: input, shape index: {}]   ;;  %s3071_s18 = inlined_call_operand.vmem [shape: f32[16,1], index: 18, kind: output, shape index: {}]  }
   0x1   :  { %3076 = sst [smem:[#allocation21_spill]] %s3053_s0  ;;  %v23_v0 = vstv %s3070_s17 }
   0x2   :  { %3077 = sst [smem:[#allocation22_spill]] %s3054_s1  ;;  %24 = vst [vmem:[#allocation2] sm:$0x1] %v23_v0 }
   0x3   :  { %3078 = sst [smem:[#allocation23_spill]] %s3055_s2 }
   0x4   :  { %3079 = sst [smem:[#allocation24_spill]] %s3058_s5 }
   0x5   :  { %3080 = sst [smem:[#allocation25_spill]] %s3059_s6 }
   0x6   :  { %3081 = sst [smem:[#allocation26_spill]] %s3061_s8 }
   0x7   :  { %3082 = sst [smem:[#allocation27_spill]] %s3063_s10 }
   0x8   :  { %3083 = sst [smem:[#allocation28_spill]] %s3065_s12 }
   0x9   :  { %3084 = sst [smem:[#allocation29_spill]] %s3068_s15 }
   0xa   :  { %3085 = sst [smem:[#allocation30_spill]] %s3069_s16 }
   0xb   :  { %3086 = sst [smem:[#allocation31_spill]] %s3071_s18 }
   0xc   :  { %25 = vsyncpa [#allocation4], 0 }
   0xd   :  { %27 = vsyncpa [#allocation4 + $0x1], 0 }
   0xe   :  { %28 = vsyncpa [#allocation6], 0 }
   0xf   :  { %29 = vsyncpa [#allocation9], 0 }
  0x10   :  { %30 = vsyncpa [#allocation12], 0 }
  0x11   :  { %31 = vsyncpa [#allocation15], 0  ;;  %s2624_s29 = smov 0   ;;  %s2626_s30 = smov 0  }
  0x12   :  { %s2628_s0 = smov 0   ;;  %s2630_s19 = smov 0  }
  0x13 LB: > { %s2512_s17 = smov [#allocation5]   ;;  %s2645_s20 = sadd.s32 4294967295, %s2510_s19   ;;  %s2510_s19 = sphi %s2630_s19, %s3118_s19   ;;  %s2506_s0 = sphi %s2628_s0, %s3117_s0   ;;  %s2502_s30 = sphi %s2626_s30, %s3116_s30   ;;  %s2498_s29 = sphi %s2624_s29, %s3115_s29  }
  0x14   : > { %s463_s1 = sshll.u32 %s2512_s17, 4  ;;  %p1586_p0 = scmp.ge.s32.totalorder %s2510_s19, 1  ;;  %s2650_s1 = int_to_ptr.vmem [resolvable:$true] %s463_s1 }
  0x15   : > { %p3074_p1 = scmp.eq.s32.totalorder %s2645_s20, 0  ;;  %p451_p2 = scmp.lt.s32.totalorder %s2510_s19, 3 }
  0x16   : > { %s2513_s22 = smov [#allocation8]   ;;  %s2514_s24 = smov [#allocation11]  }
  0x17   : > { %p2652_p3 = pnand %p1586_p0, %p451_p2  ;;  %s495_s2 = sshll.u32 %s2513_s22, 4  ;;  %s2664_s2 = int_to_ptr.vmem [resolvable:$true] %s495_s2 }
  0x18   : > { %s533_s25 = sshll.u32 %s2514_s24, 4  ;;  %s3089_s28 = sld [smem:[#allocation22_spill]]  ;;  %s2666_s25 = int_to_ptr.vmem [resolvable:$true] %s533_s25 }
  0x19   : > { %s3087_s21 = scalar_select %p2652_p3, 1, 0 }
  0x1a   : > { %p2138_p4 = pneg %p2652_p3 }
  0x1c   : > { %p2660_p5 = pnand %p2138_p4, %p3074_p1 }
  0x1e   : > { %s2234_s17 = scalar_lea.hbm %s3089_s28, 256  ;;  %p2676_p7 = pneg %p2660_p5 }
  0x1f   : > { %p2235_p6 = scmp.ne.s32.totalorder %s3089_s28, %s2234_s17  ;;  %p2241_p10 = scmp.lt.u32.totalorder %s2234_s17, %s3089_s28 }
  0x21   : > { %p2237_p8 = pnand %p2676_p7, %p2235_p6 }
  0x23   : > { %p2238_p9 = pneg %p2237_p8 }
  0x25   : > { %p2243_p11 = pnand %p2241_p10, %p2238_p9 }
  0x27   : > { %2246 = shalt.err (!%p2243_p11)
}
  0x28   : > { %s2247_s16 = scalar_lea.vmem %s2650_s1, 256  ;;  %p2255_p2 = scmp.lt.s32.totalorder %s2650_s1, %s2650_s1 }
  0x29   : > { %p2248_p12 = scmp.ne.s32.totalorder %s2650_s1, %s2247_s16  ;;  %p2256_p4 = scmp.lt.s32.totalorder %s2247_s16, %s2247_s16 }
  0x2b   : > { %p2250_p13 = pnand %p2248_p12, %p2676_p7  ;;  %p2257_p6 = por %p2256_p4, %p2255_p2 }
  0x2d   : > { %p2251_p0 = pneg %p2250_p13 }
  0x2f   : > { %p2258_p8 = pnand %p2257_p6, %p2251_p0 }
  0x31   : > { %2261 = shalt.err (!%p2258_p8)
}
  0x32   : > { %s2515_s18 = smov 128   ;;  %s2516_s15 = smov 8  }
  0x33   : > { %2141 = dma.hbm_to_vmem [thread:$0]  (!%p2660_p5), %s3089_s28, 256, %s2650_s1, [#allocation6], %s2515_s18, %s2515_s18, %s2516_s15  }
  0x34   : > { %s3091_s5 = sld [smem:[#allocation24_spill]] }
  0x3a   : > { %s2262_s16 = scalar_lea.hbm %s3091_s5, 2048 }
  0x3b   : > { %p2263_p9 = scmp.ne.s32.totalorder %s3091_s5, %s2262_s16  ;;  %p2269_p12 = scmp.lt.u32.totalorder %s2262_s16, %s3091_s5 }
  0x3d   : > { %p2265_p10 = pnand %p2263_p9, %p2676_p7 }
  0x3f   : > { %p2266_p11 = pneg %p2265_p10 }
  0x41   : > { %p2271_p13 = pnand %p2269_p12, %p2266_p11 }
  0x43   : > { %2274 = shalt.err (!%p2271_p13)
}
  0x44   : > { %s2275_s1 = scalar_lea.vmem %s2664_s2, 2048  ;;  %p2283_p6 = scmp.lt.s32.totalorder %s2664_s2, %s2664_s2 }
  0x45   : > { %p2276_p0 = scmp.ne.s32.totalorder %s2664_s2, %s2275_s1  ;;  %p2284_p8 = scmp.lt.s32.totalorder %s2275_s1, %s2275_s1 }
  0x47   : > { %p2278_p2 = pnand %p2276_p0, %p2676_p7  ;;  %p2285_p9 = por %p2284_p8, %p2283_p6 }
  0x49   : > { %p2279_p4 = pneg %p2278_p2 }
  0x4b   : > { %p2286_p10 = pnand %p2285_p9, %p2279_p4 }
  0x4d   : > { %2289 = shalt.err (!%p2286_p10)
}
  0x4e   : > { %2147 = dma.hbm_to_vmem [thread:$0]  (!%p2660_p5), %s3091_s5, 2048, %s2664_s2, [#allocation9], %s2515_s18, %s2515_s18, %s2516_s15  }
  0x4f   : > { %s2290_s26 = scalar_lea.hbm %s3064_s11, 2048 }
  0x50   : > { %p2291_p11 = scmp.ne.s32.totalorder %s3064_s11, %s2290_s26  ;;  %p2297_p0 = scmp.lt.u32.totalorder %s2290_s26, %s3064_s11 }
  0x52   : > { %p2293_p12 = pnand %p2291_p11, %p2676_p7 }
  0x54   : > { %p2294_p13 = pneg %p2293_p12 }
  0x56   : > { %p2299_p2 = pnand %p2297_p0, %p2294_p13 }
  0x58   : > { %2302 = shalt.err (!%p2299_p2)
}
  0x59   : > { %s2303_s2 = scalar_lea.vmem %s2666_s25, 2048  ;;  %p2311_p9 = scmp.lt.s32.totalorder %s2666_s25, %s2666_s25 }
  0x5a   : > { %p2304_p4 = scmp.ne.s32.totalorder %s2666_s25, %s2303_s2  ;;  %p2312_p10 = scmp.lt.s32.totalorder %s2303_s2, %s2303_s2 }
  0x5c   : > { %p2306_p6 = pnand %p2304_p4, %p2676_p7  ;;  %p2313_p11 = por %p2312_p10, %p2311_p9 }
  0x5e   : > { %p2307_p8 = pneg %p2306_p6 }
  0x60   : > { %p2314_p12 = pnand %p2313_p11, %p2307_p8 }
  0x62   : > { %2317 = shalt.err (!%p2314_p12)
}
  0x63   : > { %2153 = dma.hbm_to_vmem [thread:$0]  (!%p2660_p5), %s3064_s11, 2048, %s2666_s25, [#allocation12], %s2515_s18, %s2515_s18, %s2516_s15  }
  0x64   : > { %s2517_s8 = smov [#allocation7]   ;;  %s2518_s12 = smov [#allocation10]  }
  0x65   : > { %s479_s10 = sshll.u32 %s2517_s8, 4  ;;  %s517_s26 = sshll.u32 %s2518_s12, 4  ;;  %s480_s10 = int_to_ptr.vmem [resolvable:$true] %s479_s10  ;;  %s518_s26 = int_to_ptr.vmem [resolvable:$true] %s517_s26 }
  0x66   : > { %s2318_s24 = scalar_lea.hbm %s3056_s3, 2048 }
  0x67   : > { %p2319_p13 = scmp.ne.s32.totalorder %s3056_s3, %s2318_s24  ;;  %p2325_p4 = scmp.lt.u32.totalorder %s2318_s24, %s3056_s3 }
  0x69   : > { %p2321_p0 = pnand %p2319_p13, %p2676_p7 }
  0x6b   : > { %p2322_p2 = pneg %p2321_p0 }
  0x6d   : > { %p2327_p6 = pnand %p2325_p4, %p2322_p2 }
  0x6f   : > { %2330 = shalt.err (!%p2327_p6)
}
  0x70   : > { %s2331_s25 = scalar_lea.vmem %s480_s10, 2048  ;;  %p2339_p11 = scmp.lt.s32.totalorder %s480_s10, %s480_s10 }
  0x71   : > { %p2332_p8 = scmp.ne.s32.totalorder %s480_s10, %s2331_s25  ;;  %p2340_p12 = scmp.lt.s32.totalorder %s2331_s25, %s2331_s25 }
  0x73   : > { %p2334_p9 = pnand %p2332_p8, %p2676_p7  ;;  %p2341_p1 = por %p2340_p12, %p2339_p11 }
  0x75   : > { %p2335_p10 = pneg %p2334_p9 }
  0x77   : > { %p2342_p3 = pnand %p2341_p1, %p2335_p10 }
  0x79   : > { %2345 = shalt.err (!%p2342_p3)
}
  0x7a   : > { %2144 = dma.hbm_to_vmem [thread:$0]  (!%p2660_p5), %s3056_s3, 2048, %s480_s10, [#allocation6], %s2515_s18, %s2515_s18, %s2516_s15  }
  0x7b   : > { %s2346_s27 = scalar_lea.hbm %s3062_s9, 2048 }
  0x7c   : > { %p2347_p1 = scmp.ne.s32.totalorder %s3062_s9, %s2346_s27  ;;  %p2353_p0 = scmp.lt.u32.totalorder %s2346_s27, %s3062_s9 }
  0x7e   : > { %p2349_p3 = pnand %p2347_p1, %p2676_p7 }
  0x80   : > { %p2350_p13 = pneg %p2349_p3 }
  0x82   : > { %p2355_p2 = pnand %p2353_p0, %p2350_p13 }
  0x84   : > { %2358 = shalt.err (!%p2355_p2)
}
  0x85   : > { %s2359_s1 = scalar_lea.vmem %s518_s26, 2048  ;;  %p2367_p9 = scmp.lt.s32.totalorder %s518_s26, %s518_s26 }
  0x86   : > { %p2360_p4 = scmp.ne.s32.totalorder %s518_s26, %s2359_s1  ;;  %p2368_p10 = scmp.lt.s32.totalorder %s2359_s1, %s2359_s1 }
  0x88   : > { %p2362_p6 = pnand %p2360_p4, %p2676_p7  ;;  %p2369_p11 = por %p2368_p10, %p2367_p9 }
  0x8a   : > { %p2363_p8 = pneg %p2362_p6 }
  0x8c   : > { %p2370_p12 = pnand %p2369_p11, %p2363_p8 }
  0x8e   : > { %2373 = shalt.err (!%p2370_p12)
}
  0x8f   : > { %2150 = dma.hbm_to_vmem [thread:$0]  (!%p2660_p5), %s3062_s9, 2048, %s518_s26, [#allocation9], %s2515_s18, %s2515_s18, %s2516_s15  }
  0x90   : > { %s2519_s5 = smov [#allocation13]   ;;  %s2520_s8 = smov [#allocation14]  }
  0x91   : > { %s549_s6 = sshll.u32 %s2519_s5, 4  ;;  %s562_s12 = sshll.u32 %s2520_s8, 4  ;;  %s550_s6 = int_to_ptr.vmem [resolvable:$true] %s549_s6  ;;  %s563_s12 = int_to_ptr.vmem [resolvable:$true] %s562_s12 }
  0x92   : > { %s2374_s24 = scalar_lea.hbm %s3066_s13, 2048 }
  0x93   : > { %p2375_p1 = scmp.ne.s32.totalorder %s3066_s13, %s2374_s24  ;;  %p2381_p0 = scmp.lt.u32.totalorder %s2374_s24, %s3066_s13 }
  0x95   : > { %p2377_p3 = pnand %p2375_p1, %p2676_p7 }
  0x97   : > { %p2378_p13 = pneg %p2377_p3 }
  0x99   : > { %p2383_p2 = pnand %p2381_p0, %p2378_p13 }
  0x9b   : > { %2386 = shalt.err (!%p2383_p2)
}
  0x9c   : > { %s2387_s26 = scalar_lea.vmem %s550_s6, 2048  ;;  %p2395_p9 = scmp.lt.s32.totalorder %s550_s6, %s550_s6 }
  0x9d   : > { %p2388_p4 = scmp.ne.s32.totalorder %s550_s6, %s2387_s26  ;;  %p2396_p10 = scmp.lt.s32.totalorder %s2387_s26, %s2387_s26 }
  0x9f   : > { %p2390_p6 = pnand %p2388_p4, %p2676_p7  ;;  %p2397_p11 = por %p2396_p10, %p2395_p9 }
  0xa1   : > { %p2391_p8 = pneg %p2390_p6 }
  0xa3   : > { %p2398_p12 = pnand %p2397_p11, %p2391_p8 }
  0xa5   : > { %2401 = shalt.err (!%p2398_p12)
}
  0xa6   : > { %2156 = dma.hbm_to_vmem [thread:$0]  (!%p2660_p5), %s3066_s13, 2048, %s550_s6, [#allocation12], %s2515_s18, %s2515_s18, %s2516_s15  }
  0xa7   : > { %s2402_s17 = scalar_lea.hbm %s3067_s14, 2048 }
  0xa8   : > { %p2403_p1 = scmp.ne.s32.totalorder %s3067_s14, %s2402_s17  ;;  %p2409_p0 = scmp.lt.u32.totalorder %s2402_s17, %s3067_s14 }
  0xaa   : > { %p2405_p3 = pnand %p2403_p1, %p2676_p7 }
  0xac   : > { %p2406_p13 = pneg %p2405_p3 }
  0xae   : > { %p2411_p2 = pnand %p2409_p0, %p2406_p13 }
  0xb0   : > { %2414 = shalt.err (!%p2411_p2)
}
  0xb1   : > { %s2415_s10 = scalar_lea.vmem %s563_s12, 2048  ;;  %p2423_p9 = scmp.lt.s32.totalorder %s563_s12, %s563_s12 }
  0xb2   : > { %p2416_p4 = scmp.ne.s32.totalorder %s563_s12, %s2415_s10  ;;  %p2424_p10 = scmp.lt.s32.totalorder %s2415_s10, %s2415_s10 }
  0xb4   : > { %p2418_p6 = pnand %p2416_p4, %p2676_p7  ;;  %p2425_p11 = por %p2424_p10, %p2423_p9 }
  0xb6   : > { %p2419_p8 = pneg %p2418_p6 }
  0xb8   : > { %p2426_p12 = pnand %p2425_p11, %p2419_p8 }
  0xba   : > { %2429 = shalt.err (!%p2426_p12)
}
  0xbb   : > { %2159 = dma.hbm_to_vmem [thread:$0]  (!%p2660_p5), %s3067_s14, 2048, %s563_s12, [#allocation15], %s2515_s18, %s2515_s18, %s2516_s15  }
  0xbc   : > { %s2837_s23 = sadd.s32 1, %s2510_s19   ;;  %s44_s25 = sadd.s32 1, %s2506_s0 }
  0xbd   : > { %s41_s22 = ssub.s32 %s2510_s19, %s2837_s23  ;;  %p51_p1 = scmp.ne.s32.totalorder %s2506_s0, %s2502_s30 }
  0xbe   : > { %p42_p7 = scmp.eq.s32.totalorder %s41_s22, 0  ;;  %p52_p3 = scmp.eq.s32.totalorder %s2510_s19, 0 }
  0xbf   : > { %p57_p13 = scmp.ne.s32.totalorder %s2502_s30, %s2498_s29  ;;  %p3092_p2 = scmp.eq.s32.totalorder %s2645_s20, 0 }
  0xc0   : > { %s2848_s5 = scalar_select %p42_p7, %s2506_s0, %s44_s25  }
  0xc1   : > { %p53_p0 = por %p52_p3, %p51_p1  ;;  %p2852_p4 = por %p3092_p2, %p57_p13 }
  0xc2   : > { %p2171_p6 = scmp.lt.s32.totalorder %s2510_s19, 2  ;;  %s585_s27 = sand.u32 1, %s2506_s0  }
  0xc3   : > { %s1595_s18 = sshll.u32 %s585_s27, 3  ;;  %s1596_s15 = sshll.u32 %s2510_s19, 7 }
  0xc4   : > { %s3094_s24 = sld [smem:[#allocation21_spill]]  ;;  %s589_s29 = scalar_lea.vmem [#allocation3], %s1595_s18 }
  0xc5   : > { %s596_s2 = sshll.u32 %s589_s29, 4  ;;  %p2866_p5 = pnand %p2171_p6, %p53_p0  ;;  %s2864_s2 = int_to_ptr.vmem [resolvable:$true] %s596_s2 }
  0xc6   : > { %s586_s19 = scalar_lea.sflag [#allocation4], %s585_s27 }
  0xc7   : > { %p2432_p9 = pneg %p2866_p5 }
  0xca   : > { %s2862_s16 = scalar_lea.hbm %s3094_s24, %s1596_s15  ;;  %s2435_s22 = scalar_lea.hbm %s3094_s24, 256 }
  0xcb   : > { %s2430_s10 = scalar_lea.hbm %s2862_s16, 128  ;;  %p2436_p12 = scmp.lt.u32.totalorder %s2862_s16, %s3094_s24 }
  0xcc   : > { %p2431_p8 = scmp.ne.s32.totalorder %s2862_s16, %s2430_s10  ;;  %p2437_p7 = scmp.lt.u32.totalorder %s2435_s22, %s2430_s10 }
  0xcd   : > { %p2439_p3 = scmp.lt.u32.totalorder %s2430_s10, %s2862_s16 }
  0xce   : > { %p2433_p10 = pnand %p2432_p9, %p2431_p8  ;;  %p2438_p1 = por %p2437_p7, %p2436_p12 }
  0xd0   : > { %p2434_p11 = pneg %p2433_p10  ;;  %p2440_p13 = por %p2439_p3, %p2438_p1 }
  0xd2   : > { %p2441_p0 = pnand %p2440_p13, %p2434_p11 }
  0xd4   : > { %2444 = shalt.err (!%p2441_p0)
}
  0xd5   : > { %s2445_s27 = scalar_lea.vmem %s2864_s2, 128  ;;  %s2521_s15 = smov [#allocation3]  }
  0xd6   : > { %p2446_p2 = scmp.ne.s32.totalorder %s2864_s2, %s2445_s27  ;;  %s2450_s12 = sshll.u32 %s2521_s15, 4  ;;  %s2451_s12 = int_to_ptr.vmem [resolvable:$false] %s2450_s12 }
  0xd7   : > { %s2452_s17 = scalar_lea.vmem %s2451_s12, 256  ;;  %p2453_p10 = scmp.lt.s32.totalorder %s2864_s2, %s2451_s12 }
  0xd8   : > { %p2448_p6 = pnand %p2446_p2, %p2432_p9  ;;  %p2454_p12 = scmp.lt.s32.totalorder %s2452_s17, %s2445_s27 }
  0xda   : > { %p2449_p8 = pneg %p2448_p6  ;;  %p2455_p7 = por %p2454_p12, %p2453_p10 }
  0xdc   : > { %p2456_p1 = pnand %p2455_p7, %p2449_p8 }
  0xde   : > { %2459 = shalt.err (!%p2456_p1)
}
  0xdf   : > { %2163 = dma.hbm_to_vmem [thread:$0]  (!%p2866_p5), %s2862_s16, 128, %s2864_s2, %s586_s19  }
  0xe0   : > { %p3096_p11 = scmp.ne.s32.totalorder %s3087_s21, 0 }
  0xe1   : > { %s607_s29 = sand.u32 (!%p3096_p11), 1, %s2502_s30  }
  0xe2   : > { %605 = sbr.rel (%p3096_p11) target bundleno = 1567 (0x61f), region = 92  ;;  %s2898_s10 = sshll.u32 (!%p3096_p11), %s607_s29, 3 }
  0xe3   : > { %s608_s6 = scalar_lea.sflag (!%p3096_p11), [#allocation4], %s607_s29  ;;  %s611_s26 = scalar_lea.vmem (!%p3096_p11), [#allocation3], %s2898_s10 }
  0xe9   : > { %2477 = dma.done.wait (%p2852_p4), %s608_s6, 128  }
  0xea   : > { %2479 = vsyncadd (%p2852_p4), %s608_s6, 4294967168  ;;  %p3097_p9 = scmp.eq.s32.totalorder %s2645_s20, 0 }
  0xec   : > { %2481 = dma.done.wait (%p3097_p9), [#allocation6], 2304   ;;  %p3098_p5 = pmov %p3097_p9 }
  0xee   : > { %2483 = vsyncadd (%p3098_p5), [#allocation6], 4294964992  ;;  %p3099_p3 = pmov %p3098_p5 }
  0xf0   : > { %2485 = dma.done.wait (%p3099_p3), [#allocation9], 4096   ;;  %p3100_p13 = pmov %p3099_p3 }
  0xf1   : > { %p3101_p0 = pmov %p3099_p3 }
  0xf2   : > { %2487 = vsyncadd (%p3100_p13), [#allocation9], 4294963200 }
  0xf3   : > { %2489 = dma.done.wait (%p3101_p0), [#allocation12], 4096   ;;  %p3102_p2 = pmov %p3101_p0 }
  0xf4   : > { %p3103_p4 = pmov %p3101_p0 }
  0xf5   : > { %2491 = vsyncadd (%p3102_p2), [#allocation12], 4294963200 }
  0xf6   : > { %2493 = dma.done.wait (%p3103_p4), [#allocation15], 2048   ;;  %p3104_p6 = pmov %p3101_p0 }
  0xf7   : > { %v2522_v1 = vmov 0.0|0.0   ;;  %vm2523_vm0 = vmmov 0   ;;  %v2524_v2 = vmov 0.0   ;;  %vm709_vm1 = vcmask 1045504   ;;  %v696_v3 = vld [vmem:[#allocation5] sm:$0xff]  ;;  %v784_v7 = vld [vmem:[#allocation7] sm:$0xff] }
  0xf8   : > { %2495 = vsyncadd (%p3104_p6), [#allocation15], 4294965248  ;;  %1956 = vmatprep.subr.bf16.mxu0 %v2522_v1  ;;  %1960 = vmatprep.subr.bf16.mxu1 %v2522_v1  ;;  %v697_v4 = vld [vmem:[#allocation5 + $0x8] sm:$0x3f]  ;;  %vm2525_vm2 = vmmov 1   ;;  %v785_v8 = vld [vmem:[#allocation7 + $0x8] sm:$0xff] }
  0xf9   : > { %1736 = vmatprep.mubr.msk.f32.mxu0 %vm2523_vm0, %v2524_v2  ;;  %1771 = vmatprep.mubr.msk.f32.mxu1 %vm2523_vm0, %v2524_v2  ;;  %vm2927_vm3 = vmpackc.low %vm709_vm1, %vm2525_vm2  ;;  %v1957_v6 = vpack.c.bf16 %v697_v4, %v696_v3  ;;  %v786_v9 = vld [vmem:[#allocation7 + $0x10] sm:$0xff]  ;;  %v1961_v10 = vpack.c.bf16 %v785_v8, %v784_v7  ;;  %v787_v11 = vld [vmem:[#allocation7 + $0x18] sm:$0xff]  ;;  %vm705_vm4 = vcmask 113664   ;;  %s3107_s16 = sld [smem:[#allocation23_spill]]  ;;  %s3108_s12 = sld [smem:[#allocation26_spill]]  ;;  %vm1451_vm5 = vcmask 7168  }
  0xfa   : > { %v2933_v12 = vld [vmem:[%s611_s26] sm:$0xff]  ;;  %v1964_v13 = vpack.c.bf16 %v787_v11, %v786_v9  ;;  %v790_v17 = vld [vmem:[#allocation7 + $0x30] sm:$0xff]  ;;  %v791_v18 = vld [vmem:[#allocation7 + $0x38] sm:$0xff]  ;;  %s3109_s10 = sld [smem:[#allocation27_spill]]  ;;  %s3110_s21 = sld [smem:[#allocation25_spill]] }
  0xfb   : > { %1959 = vmatpush3.bf16.msk.msra.mxu0 %vm2927_vm3, %v1957_v6  ;;  %1962 = vmatpush3.bf16.msra.mxu1 %v1961_v10  ;;  %v788_v14 = vld [vmem:[#allocation7 + $0x20] sm:$0xff]  ;;  %v789_v15 = vld [vmem:[#allocation7 + $0x28] sm:$0xff]  ;;  %v1970_v19 = vpack.c.bf16 %v791_v18, %v790_v17  ;;  %v794_v23 = vld [vmem:[#allocation7 + $0x50] sm:$0xff]  ;;  %s3111_s2 = sld [smem:[#allocation28_spill]]  ;;  %s3112_s22 = sld [smem:[#allocation29_spill]] }
  0xfc   : > { %1984 = vmatprep.subr.bf16.mxu0 %v2522_v1  ;;  %1963 = vmatprep.subr.bf16.mxu1 %v2522_v1  ;;  %v1967_v16 = vpack.c.bf16 %v789_v15, %v788_v14  ;;  %v792_v20 = vld [vmem:[#allocation7 + $0x40] sm:$0xff]  ;;  %v793_v21 = vld [vmem:[#allocation7 + $0x48] sm:$0xff]  ;;  %v795_v24 = vld [vmem:[#allocation7 + $0x58] sm:$0xff]  ;;  %s3113_s27 = sld [smem:[#allocation30_spill]]  ;;  %p691_p8 = scmp.lt.s32.totalorder %s2645_s20, 1 }
  0xfd   : > { %v1973_v22 = vpack.c.bf16 %v793_v21, %v792_v20  ;;  %v1976_v25 = vpack.c.bf16 %v795_v24, %v794_v23  ;;  %v796_v26 = vld [vmem:[#allocation7 + $0x60] sm:$0xff]  ;;  %v797_v27 = vld [vmem:[#allocation7 + $0x68] sm:$0xff]  ;;  %v798_v29 = vld [vmem:[#allocation7 + $0x70] sm:$0xff]  ;;  %s3114_s29 = sld [smem:[#allocation31_spill]] }
  0xfe   : > { %1737 = vmatmul.mubr.msk.f32.vlgmr.msra.gmra.mrb[0].mxu0 %vm705_vm4, %v2933_v12  ;;  %v1979_v28 = vpack.c.bf16 %v797_v27, %v796_v26  ;;  %v799_v30 = vld [vmem:[#allocation7 + $0x78] sm:$0xff]  ;;  %v879_v32 = vld [vmem:[#allocation8] sm:$0xff]  ;;  %v880_v33 = vld [vmem:[#allocation8 + $0x8] sm:$0xff]  ;;  %s3120_s20 = smov (!%p691_p8, %s2645_s20), 1 }
  0xff   : > { %1806 = vmatprep.mubr.msk.f32.mxu0 %vm2523_vm0, %v2524_v2  ;;  %1965 = vmatpush3.bf16.msra.mxu1 %v1964_v13  ;;  %v1982_v31 = vpack.c.bf16 %v799_v30, %v798_v29  ;;  %v881_v34 = vld [vmem:[#allocation8 + $0x10] sm:$0xff]  ;;  %v1985_v35 = vpack.c.bf16 %v880_v33, %v879_v32  ;;  %v882_v36 = vld [vmem:[#allocation8 + $0x18] sm:$0xff]  ;;  %v883_v38 = vld [vmem:[#allocation8 + $0x20] sm:$0xff]  ;;  %s1606_s15 = sshll.u32 %s3120_s20, 3 }
 0x100   : > { %1966 = vmatprep.subr.bf16.mxu1 %v2522_v1  ;;  %v1988_v37 = vpack.c.bf16 %v882_v36, %v881_v34  ;;  %v884_v39 = vld [vmem:[#allocation8 + $0x28] sm:$0xff]  ;;  %v885_v41 = vld [vmem:[#allocation8 + $0x30] sm:$0xff]  ;;  %v886_v42 = vld [vmem:[#allocation8 + $0x38] sm:$0xff] }
 0x101   : > { %1986 = vmatpush3.bf16.msra.mxu0 %v1985_v35  ;;  %v1991_v40 = vpack.c.bf16 %v884_v39, %v883_v38  ;;  %v1994_v43 = vpack.c.bf16 %v886_v42, %v885_v41  ;;  %v1607_v44 = vld [vmem:[%s3107_s16] ss:$0 sm:$0xff]  ;;  %v975_v49 = vld [vmem:[%s3060_s7 + $0x8] sm:$0x3f]  ;;  %v889_v55 = vld [vmem:[#allocation8 + $0x50] sm:$0xff] }
 0x102   : > { %1987 = vmatprep.subr.bf16.mxu0 %v2522_v1  ;;  %v974_v48 = vld [vmem:[%s3060_s7] sm:$0xff]  ;;  %v888_v53 = vld [vmem:[#allocation8 + $0x48] sm:$0xff]  ;;  %v893_v61 = vld [vmem:[#allocation8 + $0x70] sm:$0xff] }
 0x103   : > { %1968 = vmatpush3.bf16.msra.mxu1 %v1967_v16  ;;  %v2009_v50 = vpack.c.bf16 %v975_v49, %v974_v48  ;;  %v887_v52 = vld [vmem:[#allocation8 + $0x40] sm:$0xff]  ;;  %v890_v56 = vld [vmem:[#allocation8 + $0x58] sm:$0xff]  ;;  %v892_v59 = vld [vmem:[#allocation8 + $0x68] sm:$0xff] }
 0x104   : > { %1969 = vmatprep.subr.bf16.mxu1 %v2522_v1  ;;  %v1997_v54 = vpack.c.bf16 %v888_v53, %v887_v52  ;;  %v2000_v57 = vpack.c.bf16 %v890_v56, %v889_v55  ;;  %v891_v58 = vld [vmem:[#allocation8 + $0x60] sm:$0xff]  ;;  %v894_v62 = vld [vmem:[#allocation8 + $0x78] sm:$0xff]  ;;  %v1058_v9 = vld [vmem:[#allocation10 + $0x8] sm:$0xff] }
 0x105   : > { %1989 = vmatpush3.bf16.msra.mxu0 %v1988_v37  ;;  %v2003_v60 = vpack.c.bf16 %v892_v59, %v891_v58  ;;  %v2006_v63 = vpack.c.bf16 %v894_v62, %v893_v61  ;;  %v1610_v0 = vld [vmem:[%s3057_s4] ss:$0 sm:$0xff]  ;;  %v1057_v8 = vld [vmem:[#allocation10] sm:$0xff]  ;;  %v1059_v13 = vld [vmem:[#allocation10 + $0x10] sm:$0xff] }
 0x106   : > { %1990 = vmatprep.subr.bf16.mxu0 %v2522_v1  ;;  %v2013_v11 = vpack.c.bf16 %v1058_v9, %v1057_v8  ;;  %v1060_v14 = vld [vmem:[#allocation10 + $0x18] sm:$0xff]  ;;  %v1061_v16 = vld [vmem:[#allocation10 + $0x20] sm:$0xff]  ;;  %v1062_v17 = vld [vmem:[#allocation10 + $0x28] sm:$0xff] }
 0x107   : > { %1971 = vmatpush3.bf16.msra.mxu1 %v1970_v19  ;;  %v2016_v15 = vpack.c.bf16 %v1060_v14, %v1059_v13  ;;  %v2019_v18 = vpack.c.bf16 %v1062_v17, %v1061_v16  ;;  %v1063_v19 = vld [vmem:[#allocation10 + $0x30] sm:$0xff]  ;;  %v1064_v20 = vld [vmem:[#allocation10 + $0x38] sm:$0xff]  ;;  %v1066_v23 = vld [vmem:[#allocation10 + $0x48] sm:$0xff] }
 0x108   : > { %1972 = vmatprep.subr.bf16.mxu1 %v2522_v1  ;;  %v2022_v21 = vpack.c.bf16 %v1064_v20, %v1063_v19  ;;  %v1068_v26 = vld [vmem:[#allocation10 + $0x58] sm:$0xff]  ;;  %v1070_v29 = vld [vmem:[#allocation10 + $0x68] sm:$0xff]  ;;  %v1071_v32 = vld [vmem:[#allocation10 + $0x70] sm:$0xff] }
 0x109   : > { %1992 = vmatpush3.bf16.msra.mxu0 %v1991_v40  ;;  %v1072_v33 = vld [vmem:[#allocation10 + $0x78] sm:$0xff]  ;;  %v1151_v37 = vld [vmem:[#allocation11] sm:$0xff]  ;;  %v1152_v38 = vld [vmem:[#allocation11 + $0x8] sm:$0xff] }
 0x10a   : > { %1993 = vmatprep.subr.bf16.mxu0 %v2522_v1  ;;  %v2034_v35 = vpack.c.bf16 %v1072_v33, %v1071_v32  ;;  %v2037_v39 = vpack.c.bf16 %v1152_v38, %v1151_v37  ;;  %v1153_v40 = vld [vmem:[#allocation11 + $0x10] sm:$0xff]  ;;  %v1154_v41 = vld [vmem:[#allocation11 + $0x18] sm:$0xff]  ;;  %v1159_v49 = vld [vmem:[#allocation11 + $0x40] sm:$0xff] }
 0x10b   : > { %1974 = vmatpush3.bf16.msra.mxu1 %v1973_v22  ;;  %v1065_v22 = vld [vmem:[#allocation10 + $0x40] sm:$0xff]  ;;  %v2040_v42 = vpack.c.bf16 %v1154_v41, %v1153_v40  ;;  %v1161_v52 = vld [vmem:[#allocation11 + $0x50] sm:$0xff]  ;;  %v1162_v53 = vld [vmem:[#allocation11 + $0x58] sm:$0xff] }
 0x10c   : > { %1975 = vmatprep.subr.bf16.mxu1 %v2522_v1  ;;  %v2025_v24 = vpack.c.bf16 %v1066_v23, %v1065_v22  ;;  %v1163_v55 = vld [vmem:[#allocation11 + $0x60] sm:$0xff]  ;;  %v1164_v56 = vld [vmem:[#allocation11 + $0x68] sm:$0xff]  ;;  %v1165_v58 = vld [vmem:[#allocation11 + $0x70] sm:$0xff] }
 0x10d   : > { %1995 = vmatpush3.bf16.msra.mxu0 %v1994_v43  ;;  %v1155_v43 = vld [vmem:[#allocation11 + $0x20] sm:$0xff]  ;;  %v1166_v59 = vld [vmem:[#allocation11 + $0x78] sm:$0xff]  ;;  %v1262_v62 = vld [vmem:[#allocation14 + $0x8] sm:$0xff] }
 0x10e   : > { %1996 = vmatprep.subr.bf16.mxu0 %v2522_v1  ;;  %v1261_v61 = vld [vmem:[#allocation14] sm:$0xff]  ;;  %v1267_v8 = vld [vmem:[#allocation14 + $0x30] sm:$0xff]  ;;  %v1268_v9 = vld [vmem:[#allocation14 + $0x38] sm:$0xff] }
 0x10f   : > { %1977 = vmatpush3.bf16.msra.mxu1 %v1976_v25  ;;  %v1067_v25 = vld [vmem:[#allocation10 + $0x50] sm:$0xff]  ;;  %v1270_v13 = vld [vmem:[#allocation14 + $0x48] sm:$0xff]  ;;  %v1272_v16 = vld [vmem:[#allocation14 + $0x58] sm:$0xff] }
 0x110   : > { %1978 = vmatprep.subr.bf16.mxu1 %v2522_v1  ;;  %v2028_v27 = vpack.c.bf16 %v1068_v26, %v1067_v25  ;;  %v1274_v19 = vld [vmem:[#allocation14 + $0x68] sm:$0xff]  ;;  %v1615_v23 = vld [vmem:[%s3109_s10] ss:$0 sm:$0xff]  ;;  %v1251_v37 = vld [vmem:[#allocation13 + $0x30] sm:$0xff]  ;;  %s694_s10 = scalar_lea.vmem %s3114_s29, %s1606_s15 }
 0x111   : > { %1998 = vmatpush3.bf16.msra.mxu0 %v1997_v54  ;;  %v2052_v54 = vpack.c.bf16 %v1162_v53, %v1161_v52  ;;  %v1246_v25 = vld [vmem:[#allocation13 + $0x8] sm:$0xff]  ;;  %v1248_v32 = vld [vmem:[#allocation13 + $0x18] sm:$0xff]  ;;  %v1253_v41 = vld [vmem:[#allocation13 + $0x40] sm:$0xff] }
 0x112   : > { %1999 = vmatprep.subr.bf16.mxu0 %v2522_v1  ;;  %v1252_v38 = vld [vmem:[#allocation13 + $0x38] sm:$0xff] }
 0x113   : > { %1980 = vmatpush3.bf16.msra.mxu1 %v1979_v28  ;;  %v1069_v28 = vld [vmem:[#allocation10 + $0x60] sm:$0xff]  ;;  %v1611_v40 = vld [vmem:[%s3110_s21] ss:$0 sm:$0xff] }
 0x114   : > { %1981 = vmatprep.subr.bf16.mxu1 %v2522_v1  ;;  %v2031_v30 = vpack.c.bf16 %v1070_v29, %v1069_v28 }
 0x115   : > { %2001 = vmatpush3.bf16.msra.mxu0 %v2000_v57  ;;  %v2055_v57 = vpack.c.bf16 %v1164_v56, %v1163_v55  ;;  %v1275_v55 = vld [vmem:[#allocation14 + $0x70] sm:$0xff]  ;;  %v1276_v56 = vld [vmem:[#allocation14 + $0x78] sm:$0xff] }
 0x116   : > { %2002 = vmatprep.subr.bf16.mxu0 %v2522_v1 }
 0x117   : > { %1983 = vmatpush3.bf16.msra.mxu1 %v1982_v31  ;;  %v1612_v31 = vld [vmem:[%s3108_s12] ss:$0 sm:$0xff] }
 0x118   : > { %2008 = vmatprep.subr.bf16.mxu1 %v2522_v1 }
 0x119   : > { %2004 = vmatpush3.bf16.msra.mxu0 %v2003_v60  ;;  %v2058_v60 = vpack.c.bf16 %v1166_v59, %v1165_v58  ;;  %v1616_v58 = vld [vmem:[%s3111_s2] ss:$0 sm:$0xff] }
 0x11a   : > { %2005 = vmatprep.subr.bf16.mxu0 %v2522_v1 }
 0x11d   : > { %2007 = vmatpush3.bf16.msra.mxu0 %v2006_v63  ;;  %v1263_v63 = vld [vmem:[#allocation14 + $0x10] sm:$0xff] }
 0x11e   : > { %2012 = vmatprep.subr.bf16.mxu0 %v2522_v1 }
 0x1d1   : > { %v779_v45 = vpop.f32.mrb[0].mxu0 }
 0x1d2   : > { %v780_v46 = vadd.f32 %v1607_v44, %v779_v45  ;;  %v1738_v47 = vpop.f32.mrb[1].mxu0  ;;  %v1156_v44 = vld [vmem:[#allocation11 + $0x28] sm:$0xff] }
 0x1d3   : > { %v2043_v45 = vpack.c.bf16 %v1156_v44, %v1155_v43  ;;  %v1158_v47 = vld [vmem:[#allocation11 + $0x38] sm:$0xff]  ;;  %v1255_v44 = vld [vmem:[#allocation13 + $0x50] sm:$0xff] }
 0x1d4   : > { %2224 = vtanh.f32 %v780_v46  ;;  %v1157_v46 = vld [vmem:[#allocation11 + $0x30] sm:$0xff] }
 0x1d5   : > { %v2046_v48 = vpack.c.bf16 %v1158_v47, %v1157_v46  ;;  %v1257_v47 = vld [vmem:[#allocation13 + $0x60] sm:$0xff] }
 0x1de   : > { %v2225_v51 = vpop.eup %2224 }
 0x1df   : > { %1772 = vmatmul.mubr.f32.vlgmr.msra.gmra.mrb[0].mxu1 %v2225_v51 }
 0x1e0   : > { %2011 = vmatpush3.bf16.msk.msra.mxu1 %vm2927_vm3, %v2009_v50  ;;  %1813 = vmatprep.mubr.msk.f32.mxu1 %vm2523_vm0, %v2524_v2  ;;  %v1160_v50 = vld [vmem:[#allocation11 + $0x48] sm:$0xff] }
 0x1e1   : > { %2036 = vmatprep.subr.bf16.mxu1 %v2522_v1 }
 0x1e3   : > { %1814 = vmatmul.mubr.msk.f32.vlgmr.msra.gmra.mrb[2].mxu1 %vm705_vm4, %v2933_v12 }
 0x1e4   : > { %1883 = vmatprep.mubr.msk.f32.mxu1 %vm2523_vm0, %v2524_v2  ;;  %2038 = vmatpush3.bf16.msra.mxu1 %v2037_v39  ;;  %v2094_v39 = vpack.c.bf16 %v1252_v38, %v1251_v37 }
 0x1e5   : > { %2039 = vmatprep.subr.bf16.mxu1 %v2522_v1 }
 0x1e8   : > { %2041 = vmatpush3.bf16.msra.mxu1 %v2040_v42 }
 0x1e9   : > { %2042 = vmatprep.subr.bf16.mxu1 %v2522_v1 }
 0x1ec   : > { %2044 = vmatpush3.bf16.msra.mxu1 %v2043_v45  ;;  %v1256_v45 = vld [vmem:[#allocation13 + $0x58] sm:$0xff] }
 0x1ed   : > { %2045 = vmatprep.subr.bf16.mxu1 %v2522_v1  ;;  %v2100_v46 = vpack.c.bf16 %v1256_v45, %v1255_v44 }
 0x1f0   : > { %2047 = vmatpush3.bf16.msra.mxu1 %v2046_v48  ;;  %v1258_v48 = vld [vmem:[#allocation13 + $0x68] sm:$0xff] }
 0x1f1   : > { %2048 = vmatprep.subr.bf16.mxu1 %v2522_v1 }
 0x2b2   : > { %v873_v3 = vpop.f32.mrb[0].mxu1 }
 0x2b3   : > { %v874_v4 = vadd.f32 %v1610_v0, %v873_v3  ;;  %v1773_v5 = vpop.f32.mrb[1].mxu1  ;;  %v2061_v0 = vpack.c.bf16 %v1262_v62, %v1261_v61  ;;  %v1264_v3 = vld [vmem:[#allocation14 + $0x18] sm:$0xff] }
 0x2b4   : > { %v1265_v5 = vld [vmem:[#allocation14 + $0x20] sm:$0xff] }
 0x2b5   : > { %2226 = vtanh.f32 %v874_v4  ;;  %v2064_v4 = vpack.c.bf16 %v1264_v3, %v1263_v63 }
 0x2b6   : > { %v1052_v6 = vpop.f32.mrb[2].mxu1 }
 0x2b7   : > { %v1815_v7 = vpop.f32.mrb[3].mxu1  ;;  %v1053_v34 = vadd.f32 %v1612_v31, %v1052_v6  ;;  %v1266_v6 = vld [vmem:[#allocation14 + $0x28] sm:$0xff]  ;;  %v1247_v31 = vld [vmem:[#allocation13 + $0x10] sm:$0xff] }
 0x2b8   : > { %v2067_v7 = vpack.c.bf16 %v1266_v6, %v1265_v5  ;;  %v2088_v33 = vpack.c.bf16 %v1248_v32, %v1247_v31  ;;  %v1618_v6 = vld [vmem:[%s3113_s27] ss:$0 sm:$0xff] }
 0x2b9   : > { %v1056_v36 = vmax.f32 %v1053_v34, 0.0  ;;  %v1249_v34 = vld [vmem:[#allocation13 + $0x20] sm:$0xff] }
 0x2bf   : > { %v2227_v10 = vpop.eup %2226 }
 0x2c0   : > { %v2977_v12 = vadd.f32 %v2227_v10, %v2225_v51  ;;  %v2049_v51 = vpack.c.bf16 %v1160_v50, %v1159_v49  ;;  %v2070_v10 = vpack.c.bf16 %v1268_v9, %v1267_v8  ;;  %v2103_v49 = vpack.c.bf16 %v1258_v48, %v1257_v47  ;;  %v1259_v50 = vld [vmem:[#allocation13 + $0x70] sm:$0xff]  ;;  %v1619_v9 = vld [vmem:[#allocation2] ss:$0 sm:$0xff] }
 0x2c2   : > { %1807 = vmatmul.mubr.f32.vlgmr.msra.gmra.mrb[2].mxu0 %v2977_v12  ;;  %2050 = vmatpush3.bf16.msra.mxu1 %v2049_v51  ;;  %v1260_v51 = vld [vmem:[#allocation13 + $0x78] sm:$0xff] }
 0x2c3   : > { %2014 = vmatpush3.bf16.msra.mxu0 %v2013_v11  ;;  %1848 = vmatprep.mubr.msk.f32.mxu0 %vm2523_vm0, %v2524_v2  ;;  %v1269_v11 = vld [vmem:[#allocation14 + $0x40] sm:$0xff]  ;;  %v2106_v52 = vpack.c.bf16 %v1260_v51, %v1259_v50 }
 0x2c4   : > { %2015 = vmatprep.subr.bf16.mxu0 %v2522_v1  ;;  %2051 = vmatprep.subr.bf16.mxu1 %v2522_v1  ;;  %v2073_v14 = vpack.c.bf16 %v1270_v13, %v1269_v11 }
 0x2c6   : > { %2053 = vmatpush3.bf16.msra.mxu1 %v2052_v54 }
 0x2c7   : > { %2017 = vmatpush3.bf16.msra.mxu0 %v2016_v15  ;;  %2054 = vmatprep.subr.bf16.mxu1 %v2522_v1  ;;  %v1271_v15 = vld [vmem:[#allocation14 + $0x50] sm:$0xff] }
 0x2c8   : > { %2018 = vmatprep.subr.bf16.mxu0 %v2522_v1  ;;  %v2076_v17 = vpack.c.bf16 %v1272_v16, %v1271_v15 }
 0x2ca   : > { %2056 = vmatpush3.bf16.msra.mxu1 %v2055_v57  ;;  %v2082_v57 = vpack.c.bf16 %v1276_v56, %v1275_v55 }
 0x2cb   : > { %2020 = vmatpush3.bf16.msra.mxu0 %v2019_v18  ;;  %2057 = vmatprep.subr.bf16.mxu1 %v2522_v1  ;;  %v1273_v18 = vld [vmem:[#allocation14 + $0x60] sm:$0xff] }
 0x2cc   : > { %2021 = vmatprep.subr.bf16.mxu0 %v2522_v1  ;;  %v2079_v20 = vpack.c.bf16 %v1274_v19, %v1273_v18 }
 0x2ce   : > { %2059 = vmatpush3.bf16.msra.mxu1 %v2058_v60 }
 0x2cf   : > { %2023 = vmatpush3.bf16.msra.mxu0 %v2022_v21  ;;  %2084 = vmatprep.subr.bf16.mxu1 %v2522_v1 }
 0x2d0   : > { %2024 = vmatprep.subr.bf16.mxu0 %v2522_v1 }
 0x2d3   : > { %2026 = vmatpush3.bf16.msra.mxu0 %v2025_v24  ;;  %v1245_v24 = vld [vmem:[#allocation13] sm:$0xff] }
 0x2d4   : > { %2027 = vmatprep.subr.bf16.mxu0 %v2522_v1  ;;  %v2085_v29 = vpack.c.bf16 %v1246_v25, %v1245_v24 }
 0x2d7   : > { %2029 = vmatpush3.bf16.msra.mxu0 %v2028_v27 }
 0x2d8   : > { %2030 = vmatprep.subr.bf16.mxu0 %v2522_v1 }
 0x2db   : > { %2032 = vmatpush3.bf16.msra.mxu0 %v2031_v30 }
 0x2dc   : > { %2033 = vmatprep.subr.bf16.mxu0 %v2522_v1 }
 0x2df   : > { %2035 = vmatpush3.bf16.msra.mxu0 %v2034_v35  ;;  %v1250_v35 = vld [vmem:[#allocation13 + $0x28] sm:$0xff] }
 0x2e0   : > { %2060 = vmatprep.subr.bf16.mxu0 %v2522_v1 }
 0x2e2   : > { %1849 = vmatmul.mubr.f32.vlgmr.msra.gmra.mrb[4].mxu0 %v1056_v36  ;;  %v2091_v36 = vpack.c.bf16 %v1250_v35, %v1249_v34 }
 0x2e3   : > { %1918 = vmatprep.mubr.msk.f32.mxu0 %vm2523_vm0, %v2524_v2  ;;  %2062 = vmatpush3.bf16.msra.mxu0 %v2061_v0 }
 0x2e4   : > { %2063 = vmatprep.subr.bf16.mxu0 %v2522_v1 }
 0x2e7   : > { %2065 = vmatpush3.bf16.msra.mxu0 %v2064_v4 }
 0x2e8   : > { %2066 = vmatprep.subr.bf16.mxu0 %v2522_v1 }
 0x2eb   : > { %2068 = vmatpush3.bf16.msra.mxu0 %v2067_v7 }
 0x2ec   : > { %2069 = vmatprep.subr.bf16.mxu0 %v2522_v1 }
 0x2ef   : > { %2071 = vmatpush3.bf16.msra.mxu0 %v2070_v10 }
 0x2f0   : > { %2072 = vmatprep.subr.bf16.mxu0 %v2522_v1 }
 0x2f3   : > { %2074 = vmatpush3.bf16.msra.mxu0 %v2073_v14 }
 0x2f4   : > { %2075 = vmatprep.subr.bf16.mxu0 %v2522_v1 }
 0x2f7   : > { %2077 = vmatpush3.bf16.msra.mxu0 %v2076_v17 }
 0x2f8   : > { %2078 = vmatprep.subr.bf16.mxu0 %v2522_v1 }
 0x2fb   : > { %2080 = vmatpush3.bf16.msra.mxu0 %v2079_v20 }
 0x2fc   : > { %2081 = vmatprep.subr.bf16.mxu0 %v2522_v1 }
 0x2ff   : > { %2083 = vmatpush3.bf16.msra.mxu0 %v2082_v57 }
 0x395   : > { %v968_v21 = vpop.f32.mrb[2].mxu0 }
 0x396   : > { %v1808_v22 = vpop.f32.mrb[3].mxu0  ;;  %v969_v42 = vadd.f32 %v1611_v40, %v968_v21 }
 0x398   : > { %2228 = vtanh.f32 %v969_v42 }
 0x3a2   : > { %v2229_v53 = vpop.eup %2228 }
 0x3a3   : > { %v973_v54 = vadd.f32 %v2229_v53, %v2977_v12  ;;  %v1617_v12 = vld [vmem:[%s3112_s22] ss:$0 sm:$0xff] }
 0x3b5   : > { %v1146_v26 = vpop.f32.mrb[4].mxu0 }
 0x3b6   : > { %v1147_v27 = vadd.f32 %v1615_v23, %v1146_v26  ;;  %v1850_v28 = vpop.f32.mrb[5].mxu0 }
 0x3b8   : > { %v1150_v30 = vmax.f32 %v1147_v27, 0.0 }
 0x3ba   : > { %1884 = vmatmul.mubr.f32.vlgmr.msra.gmra.mrb[4].mxu1 %v1150_v30 }
 0x3bb   : > { %2086 = vmatpush3.bf16.msra.mxu1 %v2085_v29  ;;  %1953 = vmatprep.mubr.msk.f32.mxu1 %vm2523_vm0, %v2524_v2  ;;  %v1254_v2 = vld [vmem:[#allocation13 + $0x48] sm:$0xff] }
 0x3bc   : > { %2087 = vmatprep.subr.bf16.mxu1 %v2522_v1  ;;  %v2097_v43 = vpack.c.bf16 %v1254_v2, %v1253_v41 }
 0x3bf   : > { %2089 = vmatpush3.bf16.msra.mxu1 %v2088_v33 }
 0x3c0   : > { %2090 = vmatprep.subr.bf16.mxu1 %v2522_v1 }
 0x3c3   : > { %2092 = vmatpush3.bf16.msra.mxu1 %v2091_v36 }
 0x3c4   : > { %2093 = vmatprep.subr.bf16.mxu1 %v2522_v1 }
 0x3c7   : > { %2095 = vmatpush3.bf16.msra.mxu1 %v2094_v39 }
 0x3c8   : > { %2096 = vmatprep.subr.bf16.mxu1 %v2522_v1 }
 0x3cb   : > { %2098 = vmatpush3.bf16.msra.mxu1 %v2097_v43 }
 0x3cc   : > { %2099 = vmatprep.subr.bf16.mxu1 %v2522_v1 }
 0x3cf   : > { %2101 = vmatpush3.bf16.msra.mxu1 %v2100_v46 }
 0x3d0   : > { %2102 = vmatprep.subr.bf16.mxu1 %v2522_v1 }
 0x3d3   : > { %2104 = vmatpush3.bf16.msra.mxu1 %v2103_v49 }
 0x3d4   : > { %2105 = vmatprep.subr.bf16.mxu1 %v2522_v1 }
 0x3d7   : > { %2107 = vmatpush3.bf16.msra.mxu1 %v2106_v52 }
 0x3da   : > { %1954 = vmatmul.mubr.f32.vlgmr.msra.gmra.mrb[6].mxu1 %v973_v54 }
 0x48d   : > { %v1240_v59 = vpop.f32.mrb[4].mxu1 }
 0x48e   : > { %v1241_v60 = vadd.f32 %v1616_v58, %v1240_v59  ;;  %v1885_v61 = vpop.f32.mrb[5].mxu1 }
 0x490   : > { %v1244_v62 = vmax.f32 %v1241_v60, 0.0 }
 0x492   : > { %1919 = vmatmul.mubr.f32.vlgmr.msra.gmra.mrb[6].mxu0 %v1244_v62 }
 0x4ad   : > { %v1413_v63 = vpop.f32.mrb[6].mxu1 }
 0x4ae   : > { %v1955_v1 = vpop.f32.mrb[7].mxu1 }
 0x565   : > { %v1343_v0 = vpop.f32.mrb[6].mxu0 }
 0x566   : > { %v1414_v3 = vadd.f32 %v1413_v63, %v1343_v0  ;;  %v1920_v4 = vpop.f32.mrb[7].mxu0 }
 0x568   : > { %v1424_v5 = vadd.f32 %v1617_v12, %v1414_v3 }
 0x56a   : > { %2230 = vtanh.f32 %v1424_v5 }
 0x574   : > { %v2231_v7 = vpop.eup %2230 }
 0x575   : > { %v1433_v8 = vmul.f32 %v2231_v7, %v1618_v6 }
 0x577   : > { %1434 = vadd.xlane.f32.xlu0 %v1433_v8 }
 0x604   : > { %v1435_v10 = vpop.xlane.xlu0 %1434 }
 0x605   : > { %v1443_v11 = vadd.f32 %v1619_v9, %v1435_v10 }
 0x607   : > { %v1444_v13 = vadd.f32 1.0, %v1443_v11 }
 0x609   : > { %v1445_v14 = vmul.f32 1.442695, %v1444_v13 }
 0x60b   : > { %2232 = vpow2.f32 %v1445_v14 }
 0x615   : > { %v2233_v15 = vpop.eup %2232 }
 0x616   : > { %v1620_v16 = vadd.f32 -4.0, %v2233_v15 }
 0x618   : > { %v1621_v17 = vadd.f32 -2.7182817, %v1620_v16 }
 0x61a   : > { %v1449_v18 = vmax.f32 %v1621_v17, -4.0 }
 0x61c   : > { %v1450_v19 = vmin.f32 %v1449_v18, -1.0 }
 0x61e   : > { %1452 = vst.msk [vmem:[%s694_s10] sm:$0xff] %vm1451_vm5, %v1450_v19 }
 0x61f PF: > { %p34_p10 = scmp.ge.s32.totalorder %s2837_s23, 4   ;;  %s3115_s29 = smov %s2502_s30 }
 0x620   : > { %s3116_s30 = smov %s2506_s0  ;;  %s3117_s0 = smov %s2848_s5 }
 0x621   : > { %s3118_s19 = smov %s2837_s23  ;;  %36 = sbr.rel (!%p34_p10) target bundleno = 19 (0x13), region = 160 }
 0x628   :  { %1472 = vsyncpa [#allocation4], 1 }
 0x629   :  { %1474 = vsyncpa [#allocation4 + $0x1], 1 }
 0x62a   :  { %1475 = vsyncpa [#allocation6], 1 }
 0x62b   :  { %1476 = vsyncpa [#allocation9], 1 }
 0x62c   :  { %1477 = vsyncpa [#allocation12], 1 }
 0x62d   :  { %1478 = vsyncpa [#allocation15], 1 }

</bundles_post_ra>
